<compile_context>
chip_gen: v6e
topology: v6e:2x2x1
jax: 0.10.0
libtpu: 0.0.40
codegen_flags: <defaults>
</compile_context>

<pallas_src>
import functools
import math

import jax
import jax.numpy as jnp
from jax.experimental import pallas as pl
from jax.experimental.pallas import tpu as pltpu

# Homogeneous-coordinate constants (registered buffers in the PyTorch module).
MAX_INV_SCALE = 1.0 / 4.0                       # 1 / homogeneous_max_scale
MIN_INV_SCALE = 1.0 / 0.01                      # 1 / homogeneous_min_scale
H_BETA = math.log(2.0) / (1.0 - MAX_INV_SCALE)  # log(2) / (1 - 1/max_scale)
INV_H_BETA = 1.0 / H_BETA
SOFTPLUS_THRESHOLD = 20.0                       # torch F.softplus default threshold

OUT_ROWS = 8  # fc3's 4 output channels zero-padded to 8 sublanes (one tile row)


def _round_up(x, m):
    return (x + m - 1) // m * m


def _marepo_head_kernel(x_ref, w_ref, b_ref, w3_ref, b3_ref, out_ref, *,
                        num_blocks, compute_dtype):
    """One (C, tile_p) channel-major pixel slab through the whole 1x1-conv head."""

    def lin(h, k):
        # (Cout, Cin) @ (Cin, tile_p) bf16 MXU matmul with f32 accumulation;
        # bias + ReLU in f32, result cast back to bf16 (it is cast at the next
        # matmul input anyway) to halve intermediate VMEM/vreg traffic.
        y = jnp.dot(w_ref[k], h, preferred_element_type=jnp.float32) + b_ref[k]
        return jnp.maximum(y, 0.0).astype(compute_dtype)

    def lin_f32(h, k):
        # Final conv of each residual triple: keep f32 for the residual add.
        y = jnp.dot(w_ref[k], h, preferred_element_type=jnp.float32) + b_ref[k]
        return jnp.maximum(y, 0.0)

    x = x_ref[0]                                  # (C, tile_p), compute dtype

    # res3_conv1..3 + identity skip (in_channels == head_channels).
    t = lin_f32(lin(lin(x, 0), 1), 2)
    res = x.astype(jnp.float32) + t               # residual accumulator in f32

    # residual blocks (num_head_blocks is static -> plain Python loop).
    for blk in range(num_blocks):
        base = 3 + 3 * blk
        h = lin(res.astype(compute_dtype), base)
        h = lin(h, base + 1)
        res = res + lin_f32(h, base + 2)

    # fc1, fc2 (ReLU) then fc3 (no ReLU; output rows zero-padded to OUT_ROWS).
    h = lin(res.astype(compute_dtype), 3 + 3 * num_blocks)
    h = lin(h, 4 + 3 * num_blocks)
    sc = jnp.dot(w3_ref[...], h, preferred_element_type=jnp.float32) + b3_ref[...]

    # Homogeneous coordinate: softplus(h, beta) + max_inv_scale, clamp, divide.
    hz = sc[3:4, :]                               # (1, tile_p)
    bh = H_BETA * hz
    softplus = jnp.where(
        bh > SOFTPLUS_THRESHOLD, hz,
        jnp.log1p(jnp.exp(jnp.minimum(bh, SOFTPLUS_THRESHOLD))) * INV_H_BETA)
    h_slice = jnp.minimum(softplus + MAX_INV_SCALE, MIN_INV_SCALE)
    inv_h = pl.reciprocal(h_slice)                # exact; only tile_p/128 vregs
    # Rows 0..2 = xyz / h; rows 3..7 are don't-care (sliced off in the wrapper).
    out_ref[0] = (sc * inv_h).astype(out_ref.dtype)


def marepo_head(x_nchw, params, *, num_head_blocks=1, tile_p=1024,
                compute_dtype=jnp.bfloat16):
    """params: list of (weight (Cin, Cout), bias (Cout,)) in module order:
       res3_conv1..3, num_head_blocks x (c0, c1, c2), fc1, fc2, fc3."""
    N, C, H, W = x_nchw.shape
    n_sq = 5 + 3 * num_head_blocks                # number of square (C, C) convs
    assert len(params) == n_sq + 1
    head_c = params[0][0].shape[1]
    # TODO(synk): head_skip conv for in_channels != head_channels not wired in.
    assert C == head_c, "only the Identity-skip configuration is implemented"

    HW = H * W
    itm = jnp.dtype(compute_dtype).itemsize

    # Channel-major: NCHW -> (N, C, H*W) is a pure reshape (no HBM transpose).
    x = x_nchw.reshape(N, C, HW).astype(compute_dtype)

    # Stack weights in conv orientation (Cout, Cin); biases as (C, 1) columns.
    w_stack = jnp.stack([w.T for (w, _) in params[:n_sq]]).astype(compute_dtype)
    b_stack = jnp.stack([b for (_, b) in params[:n_sq]]).astype(jnp.float32)
    b_stack = b_stack.reshape(n_sq, C, 1)
    w3, b3 = params[-1]
    w3p = jnp.pad(w3.T.astype(compute_dtype),
                  ((0, OUT_ROWS - w3.shape[1]), (0, 0)))              # (8, C)
    b3p = jnp.pad(b3.astype(jnp.float32),
                  (0, OUT_ROWS - b3.shape[0])).reshape(OUT_ROWS, 1)   # (8, 1)

    # Resident (single-buffered) weight footprint; the (.,1) bias columns are
    # lane-padded to 128 inside VMEM.
    weight_vmem = (w_stack.size * itm + w3p.size * itm
                   + n_sq * C * 128 * 4 + OUT_ROWS * 128 * 4)
    weight_hbm = (w_stack.size * itm + b_stack.size * 4
                  + w3p.size * itm + b3p.size * 4)

    # Generation-aware VMEM budget (~48 MiB on v7x, ~96 MiB on v5e/v6e).
    try:
        vmem_cap = int(pltpu.get_tpu_info().vmem_capacity_bytes)
    except Exception:
        vmem_cap = 64 << 20                       # conservative fallback
    vmem_budget = (vmem_cap * 3) // 4

    def vmem_est(tp):
        return (2 * C * tp * itm                  # double-buffered input tiles
                + 2 * OUT_ROWS * tp * 4           # double-buffered output tiles
                + weight_vmem                     # single-buffered weights
                + 6 * C * tp * 4)                 # live f32 intermediates

    # tile_p: large (per-step overhead amortization, long MXU RHS), 128-aligned,
    # never wider than the problem, >=2 total grid steps when possible (so both
    # v7x TensorCores get work), and within the VMEM budget.
    tile_p = max(128, min(_round_up(tile_p, 128), _round_up(HW, 128)))
    if N * ((HW + tile_p - 1) // tile_p) < 2 and tile_p > 128:
        tile_p = max(128, _round_up((HW + 1) // 2, 128))
    while tile_p > 128 and vmem_est(tile_p) > vmem_budget:
        tile_p = max(128, _round_up(tile_p // 2, 128))

    HW_pad = _round_up(HW, tile_p)
    if HW_pad != HW:
        x = jnp.pad(x, ((0, 0), (0, 0), (0, HW_pad - HW)))

    vmem_limit = int(min(max(vmem_est(tile_p), 32 << 20), vmem_budget))

    cost = pl.CostEstimate(
        flops=2 * N * HW_pad * C * (C * n_sq + OUT_ROWS),
        transcendentals=2 * N * HW_pad,
        bytes_accessed=(N * HW_pad * C * itm + weight_hbm
                        + N * HW_pad * OUT_ROWS * 4))

    kernel = functools.partial(_marepo_head_kernel,
                               num_blocks=num_head_blocks,
                               compute_dtype=compute_dtype)

    resident = pl.Buffered(1)   # constant-index weights: single-buffer in VMEM
    # TODO(synk): in the small-C (DMA-bound) regime, pl.Buffered(3) on the x
    # spec would deepen the input pipeline further.

    out = pl.pallas_call(
        kernel,
        out_shape=jax.ShapeDtypeStruct((N, OUT_ROWS, HW_pad), jnp.float32),
        grid=(N, HW_pad // tile_p),
        in_specs=[
            pl.BlockSpec((1, C, tile_p), lambda n, j: (n, 0, j)),
            pl.BlockSpec(w_stack.shape, lambda n, j: (0, 0, 0),
                         pipeline_mode=resident),
            pl.BlockSpec(b_stack.shape, lambda n, j: (0, 0, 0),
                         pipeline_mode=resident),
            pl.BlockSpec(w3p.shape, lambda n, j: (0, 0),
                         pipeline_mode=resident),
            pl.BlockSpec(b3p.shape, lambda n, j: (0, 0),
                         pipeline_mode=resident),
        ],
        out_specs=pl.BlockSpec((1, OUT_ROWS, tile_p), lambda n, j: (n, 0, j)),
        compiler_params=pltpu.CompilerParams(
            dimension_semantics=("parallel", "parallel"),
            vmem_limit_bytes=vmem_limit),
        cost_estimate=cost,
    )(x, w_stack, b_stack, w3p, b3p)

    # Output is already channel-major: slice padded rows/columns -> NCHW.
    return out[:, :3, :HW].reshape(N, 3, H, W)


def init_params(key, c_in, c_head, num_head_blocks=1):
    """Deterministic synthetic parameters (shapes match the module's convs)."""
    shapes = [(c_in, c_head), (c_head, c_head), (c_head, c_head)]       # res3_conv1..3
    shapes += [(c_head, c_head)] * (3 * num_head_blocks)                # res blocks
    shapes += [(c_head, c_head), (c_head, c_head), (c_head, 4)]         # fc1, fc2, fc3
    params = []
    for ci, co in shapes:
        kw, kb, key = jax.random.split(key, 3)
        w = jax.random.normal(kw, (ci, co), jnp.float32) / jnp.sqrt(float(ci))
        b = jax.random.normal(kb, (co,), jnp.float32) * 0.1
        params.append((w, b))
    return params


def reference(x_nchw, params, *, num_head_blocks=1, compute_dtype=jnp.bfloat16):
    """Pure-JAX reference mirroring the PyTorch forward (same mixed precision)."""
    N, C, H, W = x_nchw.shape
    x = jnp.transpose(x_nchw, (0, 2, 3, 1)).reshape(-1, C)

    def lin(h, p, relu=True):
        y = jnp.dot(h.astype(compute_dtype), p[0].astype(compute_dtype),
                    preferred_element_type=jnp.float32) + p[1].astype(jnp.float32)
        return jnp.maximum(y, 0.0) if relu else y

    xc = x.astype(compute_dtype)
    t = lin(lin(lin(xc, params[0]), params[1]), params[2])
    res = xc.astype(jnp.float32) + t
    for blk in range(num_head_blocks):
        base = 3 + 3 * blk
        t = lin(lin(lin(res, params[base]), params[base + 1]), params[base + 2])
        res = res + t
    sc = lin(res, params[-3])
    sc = lin(sc, params[-2])
    sc = lin(sc, params[-1], relu=False)

    h = sc[:, 3:4]
    bh = H_BETA * h
    sp = jnp.where(bh > SOFTPLUS_THRESHOLD, h,
                   jnp.log1p(jnp.exp(jnp.minimum(bh, SOFTPLUS_THRESHOLD))) / H_BETA)
    h_slice = jnp.minimum(sp + MAX_INV_SCALE, MIN_INV_SCALE)
    out = sc[:, :3] / h_slice
    return out.reshape(N, H, W, 3).transpose(0, 3, 1, 2)


if __name__ == "__main__":
    key = jax.random.PRNGKey(0)
    kx, kp = jax.random.split(key)

    # Small shapes: in_channels == head_channels == 32 (Identity skip),
    # batch=2, spatial 16x16.
    N, C, H, W = 2, 32, 16, 16
    x = jax.random.normal(kx, (N, C, H, W), jnp.float32)
    params = init_params(kp, C, C, num_head_blocks=1)

    out = marepo_head(x, params, num_head_blocks=1)
    jax.block_until_ready(out)

    ref = reference(x, params, num_head_blocks=1)
    assert out.shape == (N, 3, H, W), out.shape
    # Tolerance covers bf16 matmul rounding (accumulation-order differences
    # between channel-major and pixel-major orientations).
    assert jnp.allclose(out, ref, atol=3e-2, rtol=3e-2), float(
        jnp.max(jnp.abs(out - ref)))
    print("KERNEL_OK")
</pallas_src>

<mosaic_0001>
module attributes {stable_mosaic.version = 11 : i64} {
  func.func @_marepo_head_kernel(%arg0: i32, %arg1: i32, %arg2: memref<1x32x256xbf16, #tpu.memory_space<vmem>>, %arg3: memref<8x32x32xbf16, #tpu.memory_space<vmem>>, %arg4: memref<8x32x1xf32, #tpu.memory_space<vmem>>, %arg5: memref<8x32xbf16, #tpu.memory_space<vmem>>, %arg6: memref<8x1xf32, #tpu.memory_space<vmem>>, %arg7: memref<1x8x256xf32, #tpu.memory_space<vmem>>) attributes {dimension_semantics = [#tpu.dimension_semantics<parallel>, #tpu.dimension_semantics<parallel>], iteration_bounds = array<i64: 2, 1>, scalar_prefetch = 0 : i64, scratch_operands = 0 : i64, tpu.core_type = #tpu.core_type<tc>, window_params = [{transform_indices = @transform_0, window_bounds = array<i64: 1, 32, 256>}, {pipeline_mode = #tpu.pipeline_mode<synchronous>, transform_indices = @transform_1, window_bounds = array<i64: 8, 32, 32>}, {pipeline_mode = #tpu.pipeline_mode<synchronous>, transform_indices = @transform_2, window_bounds = array<i64: 8, 32, 1>}, {pipeline_mode = #tpu.pipeline_mode<synchronous>, transform_indices = @transform_3, window_bounds = array<i64: 8, 32>}, {pipeline_mode = #tpu.pipeline_mode<synchronous>, transform_indices = @transform_4, window_bounds = array<i64: 8, 1>}, {transform_indices = @transform_5, window_bounds = array<i64: 1, 8, 256>}]} {
    %c0 = arith.constant 0 : index
    %c0_0 = arith.constant 0 : index
    %c0_1 = arith.constant 0 : index
    %0 = vector.load %arg2[%c0, %c0_0, %c0_1] : memref<1x32x256xbf16, #tpu.memory_space<vmem>>, vector<1x32x256xbf16>
    %1 = vector.shape_cast %0 : vector<1x32x256xbf16> to vector<32x256xbf16>
    %c0_2 = arith.constant 0 : index
    %c0_3 = arith.constant 0 : index
    %c0_4 = arith.constant 0 : index
    %2 = vector.load %arg3[%c0_2, %c0_3, %c0_4] : memref<8x32x32xbf16, #tpu.memory_space<vmem>>, vector<1x32x32xbf16>
    %3 = vector.shape_cast %2 : vector<1x32x32xbf16> to vector<32x32xbf16>
    %cst = arith.constant dense<0.000000e+00> : vector<32x256xf32>
    %4 = tpu.matmul %3, %1, %cst {dimension_numbers = #tpu.dot_dimension_numbers<[1], [0], [0], [1], [0, 0, 1, 1], [], []>} : vector<32x32xbf16>, vector<32x256xbf16>, vector<32x256xf32> -> vector<32x256xf32>
    %c0_5 = arith.constant 0 : index
    %c0_6 = arith.constant 0 : index
    %c0_7 = arith.constant 0 : index
    %5 = vector.load %arg4[%c0_5, %c0_6, %c0_7] : memref<8x32x1xf32, #tpu.memory_space<vmem>>, vector<1x32x1xf32>
    %6 = vector.shape_cast %5 : vector<1x32x1xf32> to vector<32x1xf32>
    %7 = vector.broadcast %6 : vector<32x1xf32> to vector<32x256xf32>
    %8 = arith.addf %4, %7 : vector<32x256xf32>
    %cst_8 = arith.constant 0.000000e+00 : f32
    %9 = vector.broadcast %cst_8 : f32 to vector<32x256xf32>
    %10 = arith.maximumf %8, %9 : vector<32x256xf32>
    %11 = arith.truncf %10 : vector<32x256xf32> to vector<32x256xbf16>
    %c1 = arith.constant 1 : index
    %c0_9 = arith.constant 0 : index
    %c0_10 = arith.constant 0 : index
    %12 = vector.load %arg3[%c1, %c0_9, %c0_10] : memref<8x32x32xbf16, #tpu.memory_space<vmem>>, vector<1x32x32xbf16>
    %13 = vector.shape_cast %12 : vector<1x32x32xbf16> to vector<32x32xbf16>
    %cst_11 = arith.constant dense<0.000000e+00> : vector<32x256xf32>
    %14 = tpu.matmul %13, %11, %cst_11 {dimension_numbers = #tpu.dot_dimension_numbers<[1], [0], [0], [1], [0, 0, 1, 1], [], []>} : vector<32x32xbf16>, vector<32x256xbf16>, vector<32x256xf32> -> vector<32x256xf32>
    %c1_12 = arith.constant 1 : index
    %c0_13 = arith.constant 0 : index
    %c0_14 = arith.constant 0 : index
    %15 = vector.load %arg4[%c1_12, %c0_13, %c0_14] : memref<8x32x1xf32, #tpu.memory_space<vmem>>, vector<1x32x1xf32>
    %16 = vector.shape_cast %15 : vector<1x32x1xf32> to vector<32x1xf32>
    %17 = vector.broadcast %16 : vector<32x1xf32> to vector<32x256xf32>
    %18 = arith.addf %14, %17 : vector<32x256xf32>
    %cst_15 = arith.constant 0.000000e+00 : f32
    %19 = vector.broadcast %cst_15 : f32 to vector<32x256xf32>
    %20 = arith.maximumf %18, %19 : vector<32x256xf32>
    %21 = arith.truncf %20 : vector<32x256xf32> to vector<32x256xbf16>
    %c2 = arith.constant 2 : index
    %c0_16 = arith.constant 0 : index
    %c0_17 = arith.constant 0 : index
    %22 = vector.load %arg3[%c2, %c0_16, %c0_17] : memref<8x32x32xbf16, #tpu.memory_space<vmem>>, vector<1x32x32xbf16>
    %23 = vector.shape_cast %22 : vector<1x32x32xbf16> to vector<32x32xbf16>
    %cst_18 = arith.constant dense<0.000000e+00> : vector<32x256xf32>
    %24 = tpu.matmul %23, %21, %cst_18 {dimension_numbers = #tpu.dot_dimension_numbers<[1], [0], [0], [1], [0, 0, 1, 1], [], []>} : vector<32x32xbf16>, vector<32x256xbf16>, vector<32x256xf32> -> vector<32x256xf32>
    %c2_19 = arith.constant 2 : index
    %c0_20 = arith.constant 0 : index
    %c0_21 = arith.constant 0 : index
    %25 = vector.load %arg4[%c2_19, %c0_20, %c0_21] : memref<8x32x1xf32, #tpu.memory_space<vmem>>, vector<1x32x1xf32>
    %26 = vector.shape_cast %25 : vector<1x32x1xf32> to vector<32x1xf32>
    %27 = vector.broadcast %26 : vector<32x1xf32> to vector<32x256xf32>
    %28 = arith.addf %24, %27 : vector<32x256xf32>
    %cst_22 = arith.constant 0.000000e+00 : f32
    %29 = vector.broadcast %cst_22 : f32 to vector<32x256xf32>
    %30 = arith.maximumf %28, %29 : vector<32x256xf32>
    %31 = arith.extf %1 : vector<32x256xbf16> to vector<32x256xf32>
    %32 = arith.addf %31, %30 : vector<32x256xf32>
    %33 = arith.truncf %32 : vector<32x256xf32> to vector<32x256xbf16>
    %c3 = arith.constant 3 : index
    %c0_23 = arith.constant 0 : index
    %c0_24 = arith.constant 0 : index
    %34 = vector.load %arg3[%c3, %c0_23, %c0_24] : memref<8x32x32xbf16, #tpu.memory_space<vmem>>, vector<1x32x32xbf16>
    %35 = vector.shape_cast %34 : vector<1x32x32xbf16> to vector<32x32xbf16>
    %cst_25 = arith.constant dense<0.000000e+00> : vector<32x256xf32>
    %36 = tpu.matmul %35, %33, %cst_25 {dimension_numbers = #tpu.dot_dimension_numbers<[1], [0], [0], [1], [0, 0, 1, 1], [], []>} : vector<32x32xbf16>, vector<32x256xbf16>, vector<32x256xf32> -> vector<32x256xf32>
    %c3_26 = arith.constant 3 : index
    %c0_27 = arith.constant 0 : index
    %c0_28 = arith.constant 0 : index
    %37 = vector.load %arg4[%c3_26, %c0_27, %c0_28] : memref<8x32x1xf32, #tpu.memory_space<vmem>>, vector<1x32x1xf32>
    %38 = vector.shape_cast %37 : vector<1x32x1xf32> to vector<32x1xf32>
    %39 = vector.broadcast %38 : vector<32x1xf32> to vector<32x256xf32>
    %40 = arith.addf %36, %39 : vector<32x256xf32>
    %cst_29 = arith.constant 0.000000e+00 : f32
    %41 = vector.broadcast %cst_29 : f32 to vector<32x256xf32>
    %42 = arith.maximumf %40, %41 : vector<32x256xf32>
    %43 = arith.truncf %42 : vector<32x256xf32> to vector<32x256xbf16>
    %c4 = arith.constant 4 : index
    %c0_30 = arith.constant 0 : index
    %c0_31 = arith.constant 0 : index
    %44 = vector.load %arg3[%c4, %c0_30, %c0_31] : memref<8x32x32xbf16, #tpu.memory_space<vmem>>, vector<1x32x32xbf16>
    %45 = vector.shape_cast %44 : vector<1x32x32xbf16> to vector<32x32xbf16>
    %cst_32 = arith.constant dense<0.000000e+00> : vector<32x256xf32>
    %46 = tpu.matmul %45, %43, %cst_32 {dimension_numbers = #tpu.dot_dimension_numbers<[1], [0], [0], [1], [0, 0, 1, 1], [], []>} : vector<32x32xbf16>, vector<32x256xbf16>, vector<32x256xf32> -> vector<32x256xf32>
    %c4_33 = arith.constant 4 : index
    %c0_34 = arith.constant 0 : index
    %c0_35 = arith.constant 0 : index
    %47 = vector.load %arg4[%c4_33, %c0_34, %c0_35] : memref<8x32x1xf32, #tpu.memory_space<vmem>>, vector<1x32x1xf32>
    %48 = vector.shape_cast %47 : vector<1x32x1xf32> to vector<32x1xf32>
    %49 = vector.broadcast %48 : vector<32x1xf32> to vector<32x256xf32>
    %50 = arith.addf %46, %49 : vector<32x256xf32>
    %cst_36 = arith.constant 0.000000e+00 : f32
    %51 = vector.broadcast %cst_36 : f32 to vector<32x256xf32>
    %52 = arith.maximumf %50, %51 : vector<32x256xf32>
    %53 = arith.truncf %52 : vector<32x256xf32> to vector<32x256xbf16>
    %c5 = arith.constant 5 : index
    %c0_37 = arith.constant 0 : index
    %c0_38 = arith.constant 0 : index
    %54 = vector.load %arg3[%c5, %c0_37, %c0_38] : memref<8x32x32xbf16, #tpu.memory_space<vmem>>, vector<1x32x32xbf16>
    %55 = vector.shape_cast %54 : vector<1x32x32xbf16> to vector<32x32xbf16>
    %cst_39 = arith.constant dense<0.000000e+00> : vector<32x256xf32>
    %56 = tpu.matmul %55, %53, %cst_39 {dimension_numbers = #tpu.dot_dimension_numbers<[1], [0], [0], [1], [0, 0, 1, 1], [], []>} : vector<32x32xbf16>, vector<32x256xbf16>, vector<32x256xf32> -> vector<32x256xf32>
    %c5_40 = arith.constant 5 : index
    %c0_41 = arith.constant 0 : index
    %c0_42 = arith.constant 0 : index
    %57 = vector.load %arg4[%c5_40, %c0_41, %c0_42] : memref<8x32x1xf32, #tpu.memory_space<vmem>>, vector<1x32x1xf32>
    %58 = vector.shape_cast %57 : vector<1x32x1xf32> to vector<32x1xf32>
    %59 = vector.broadcast %58 : vector<32x1xf32> to vector<32x256xf32>
    %60 = arith.addf %56, %59 : vector<32x256xf32>
    %cst_43 = arith.constant 0.000000e+00 : f32
    %61 = vector.broadcast %cst_43 : f32 to vector<32x256xf32>
    %62 = arith.maximumf %60, %61 : vector<32x256xf32>
    %63 = arith.addf %32, %62 : vector<32x256xf32>
    %64 = arith.truncf %63 : vector<32x256xf32> to vector<32x256xbf16>
    %c6 = arith.constant 6 : index
    %c0_44 = arith.constant 0 : index
    %c0_45 = arith.constant 0 : index
    %65 = vector.load %arg3[%c6, %c0_44, %c0_45] : memref<8x32x32xbf16, #tpu.memory_space<vmem>>, vector<1x32x32xbf16>
    %66 = vector.shape_cast %65 : vector<1x32x32xbf16> to vector<32x32xbf16>
    %cst_46 = arith.constant dense<0.000000e+00> : vector<32x256xf32>
    %67 = tpu.matmul %66, %64, %cst_46 {dimension_numbers = #tpu.dot_dimension_numbers<[1], [0], [0], [1], [0, 0, 1, 1], [], []>} : vector<32x32xbf16>, vector<32x256xbf16>, vector<32x256xf32> -> vector<32x256xf32>
    %c6_47 = arith.constant 6 : index
    %c0_48 = arith.constant 0 : index
    %c0_49 = arith.constant 0 : index
    %68 = vector.load %arg4[%c6_47, %c0_48, %c0_49] : memref<8x32x1xf32, #tpu.memory_space<vmem>>, vector<1x32x1xf32>
    %69 = vector.shape_cast %68 : vector<1x32x1xf32> to vector<32x1xf32>
    %70 = vector.broadcast %69 : vector<32x1xf32> to vector<32x256xf32>
    %71 = arith.addf %67, %70 : vector<32x256xf32>
    %cst_50 = arith.constant 0.000000e+00 : f32
    %72 = vector.broadcast %cst_50 : f32 to vector<32x256xf32>
    %73 = arith.maximumf %71, %72 : vector<32x256xf32>
    %74 = arith.truncf %73 : vector<32x256xf32> to vector<32x256xbf16>
    %c7 = arith.constant 7 : index
    %c0_51 = arith.constant 0 : index
    %c0_52 = arith.constant 0 : index
    %75 = vector.load %arg3[%c7, %c0_51, %c0_52] : memref<8x32x32xbf16, #tpu.memory_space<vmem>>, vector<1x32x32xbf16>
    %76 = vector.shape_cast %75 : vector<1x32x32xbf16> to vector<32x32xbf16>
    %cst_53 = arith.constant dense<0.000000e+00> : vector<32x256xf32>
    %77 = tpu.matmul %76, %74, %cst_53 {dimension_numbers = #tpu.dot_dimension_numbers<[1], [0], [0], [1], [0, 0, 1, 1], [], []>} : vector<32x32xbf16>, vector<32x256xbf16>, vector<32x256xf32> -> vector<32x256xf32>
    %c7_54 = arith.constant 7 : index
    %c0_55 = arith.constant 0 : index
    %c0_56 = arith.constant 0 : index
    %78 = vector.load %arg4[%c7_54, %c0_55, %c0_56] : memref<8x32x1xf32, #tpu.memory_space<vmem>>, vector<1x32x1xf32>
    %79 = vector.shape_cast %78 : vector<1x32x1xf32> to vector<32x1xf32>
    %80 = vector.broadcast %79 : vector<32x1xf32> to vector<32x256xf32>
    %81 = arith.addf %77, %80 : vector<32x256xf32>
    %cst_57 = arith.constant 0.000000e+00 : f32
    %82 = vector.broadcast %cst_57 : f32 to vector<32x256xf32>
    %83 = arith.maximumf %81, %82 : vector<32x256xf32>
    %84 = arith.truncf %83 : vector<32x256xf32> to vector<32x256xbf16>
    %c0_58 = arith.constant 0 : index
    %c0_59 = arith.constant 0 : index
    %85 = vector.load %arg5[%c0_58, %c0_59] : memref<8x32xbf16, #tpu.memory_space<vmem>>, vector<8x32xbf16>
    %cst_60 = arith.constant dense<0.000000e+00> : vector<8x256xf32>
    %86 = tpu.matmul %85, %84, %cst_60 {dimension_numbers = #tpu.dot_dimension_numbers<[1], [0], [0], [1], [0, 0, 1, 1], [], []>} : vector<8x32xbf16>, vector<32x256xbf16>, vector<8x256xf32> -> vector<8x256xf32>
    %c0_61 = arith.constant 0 : index
    %c0_62 = arith.constant 0 : index
    %87 = vector.load %arg6[%c0_61, %c0_62] : memref<8x1xf32, #tpu.memory_space<vmem>>, vector<8x1xf32>
    %88 = vector.broadcast %87 : vector<8x1xf32> to vector<8x256xf32>
    %89 = arith.addf %86, %88 : vector<8x256xf32>
    %90 = vector.extract_strided_slice %89 {offsets = [3, 0], sizes = [1, 256], strides = [1, 1]} : vector<8x256xf32> to vector<1x256xf32>
    %cst_63 = arith.constant 0.924196243 : f32
    %91 = vector.broadcast %cst_63 : f32 to vector<1x256xf32>
    %92 = arith.mulf %91, %90 : vector<1x256xf32>
    %cst_64 = arith.constant 2.000000e+01 : f32
    %93 = vector.broadcast %cst_64 : f32 to vector<1x256xf32>
    %94 = arith.cmpf ogt, %92, %93 : vector<1x256xf32>
    %cst_65 = arith.constant 2.000000e+01 : f32
    %95 = vector.broadcast %cst_65 : f32 to vector<1x256xf32>
    %96 = arith.minimumf %92, %95 : vector<1x256xf32>
    %97 = math.exp %96 : vector<1x256xf32>
    %98 = math.log1p %97 : vector<1x256xf32>
    %cst_66 = arith.constant 1.08202124 : f32
    %99 = vector.broadcast %cst_66 : f32 to vector<1x256xf32>
    %100 = arith.mulf %98, %99 : vector<1x256xf32>
    %101 = arith.select %94, %90, %100 : vector<1x256xi1>, vector<1x256xf32>
    %cst_67 = arith.constant 2.500000e-01 : f32
    %102 = vector.broadcast %cst_67 : f32 to vector<1x256xf32>
    %103 = arith.addf %101, %102 : vector<1x256xf32>
    %cst_68 = arith.constant 1.000000e+02 : f32
    %104 = vector.broadcast %cst_68 : f32 to vector<1x256xf32>
    %105 = arith.minimumf %103, %104 : vector<1x256xf32>
    %106 = tpu.reciprocal %105 : vector<1x256xf32> -> vector<1x256xf32>
    %107 = vector.broadcast %106 : vector<1x256xf32> to vector<8x256xf32>
    %108 = arith.mulf %89, %107 : vector<8x256xf32>
    %c0_69 = arith.constant 0 : index
    %c0_70 = arith.constant 0 : index
    %c0_71 = arith.constant 0 : index
    %109 = vector.load %arg7[%c0_69, %c0_70, %c0_71] : memref<1x8x256xf32, #tpu.memory_space<vmem>>, vector<1x8x256xf32>
    %110 = vector.shape_cast %109 : vector<1x8x256xf32> to vector<8x256xf32>
    %111 = vector.shape_cast %108 : vector<8x256xf32> to vector<1x8x256xf32>
    tpu.vector_store %arg7[%c0_69, %c0_70, %c0_71], %111 {strides = array<i32>} : memref<1x8x256xf32, #tpu.memory_space<vmem>>, vector<1x8x256xf32>,
    return
  }
  func.func @transform_0(%arg0: i32, %arg1: i32) -> (i32, i32, i32) {
    %c0_i32 = arith.constant 0 : i32
    %c0_i32_0 = arith.constant 0 : i32
    return %arg0, %c0_i32, %arg1 : i32, i32, i32
  }
  func.func @transform_1(%arg0: i32, %arg1: i32) -> (i32, i32, i32) {
    %c0_i32 = arith.constant 0 : i32
    %c0_i32_0 = arith.constant 0 : i32
    %c0_i32_1 = arith.constant 0 : i32
    %c0_i32_2 = arith.constant 0 : i32
    return %c0_i32, %c0_i32_0, %c0_i32_1 : i32, i32, i32
  }
  func.func @transform_2(%arg0: i32, %arg1: i32) -> (i32, i32, i32) {
    %c0_i32 = arith.constant 0 : i32
    %c0_i32_0 = arith.constant 0 : i32
    %c0_i32_1 = arith.constant 0 : i32
    %c0_i32_2 = arith.constant 0 : i32
    return %c0_i32, %c0_i32_0, %c0_i32_1 : i32, i32, i32
  }
  func.func @transform_3(%arg0: i32, %arg1: i32) -> (i32, i32) {
    %c0_i32 = arith.constant 0 : i32
    %c0_i32_0 = arith.constant 0 : i32
    %c0_i32_1 = arith.constant 0 : i32
    return %c0_i32, %c0_i32_0 : i32, i32
  }
  func.func @transform_4(%arg0: i32, %arg1: i32) -> (i32, i32) {
    %c0_i32 = arith.constant 0 : i32
    %c0_i32_0 = arith.constant 0 : i32
    %c0_i32_1 = arith.constant 0 : i32
    return %c0_i32, %c0_i32_0 : i32, i32
  }
  func.func @transform_5(%arg0: i32, %arg1: i32) -> (i32, i32, i32) {
    %c0_i32 = arith.constant 0 : i32
    %c0_i32_0 = arith.constant 0 : i32
    return %arg0, %c0_i32, %arg1 : i32, i32, i32
  }
}

</mosaic_0001>

<bundles_post_ra>
// kernel: tpu_custom_call.1
= control target key start
LH: loop header
LB: loop body
LE: loop exit
PB: predicated region body
PF: predicated region fallthrough
CT: control target
= control target key end

     0   :  { %10 = vsyncpa [#allocation3], 0  ;;  %s2033_s0 = inlined_call_operand.vmem [shape: bf16[2,32,256], index: 0, kind: input, shape index: {}]   ;;  %s2034_s1 = inlined_call_operand.vmem [shape: bf16[8,32,32], index: 1, kind: input, shape index: {}]   ;;  %s2035_s2 = inlined_call_operand.vmem [shape: f32[8,32,1], index: 2, kind: input, shape index: {}]   ;;  %s2036_s3 = inlined_call_operand.vmem [shape: bf16[8,32], index: 3, kind: input, shape index: {}]   ;;  %s2037_s4 = inlined_call_operand.vmem [shape: f32[8,1], index: 4, kind: input, shape index: {}]   ;;  %s2038_s5 = inlined_call_operand.hbm [shape: f32[2,8,256], index: 5, kind: output, shape index: {}]  }
   0x1   :  { %12 = vsyncpa [#allocation3 + $0x1], 0  ;;  %s1692_s18 = smov 0   ;;  %s1694_s19 = smov 0  }
   0x2   :  { %s1696_s20 = smov 0   ;;  %s1698_s21 = smov 0  }
   0x3   :  { %s1700_s22 = smov 0   ;;  %s1702_s23 = smov 0  }
   0x4 LB: > { %s1384_s24 = sadd.s32 4294967295, %s1658_s23   ;;  %s1385_s25 = sadd.s32 4294967294, %s1658_s23   ;;  %s1658_s23 = sphi %s1702_s23, %s18_s23   ;;  %s1654_s22 = sphi %s1700_s22, %s2045_s22   ;;  %s1650_s21 = sphi %s1698_s21, %s2044_s21   ;;  %s1646_s20 = sphi %s1696_s20, %s2043_s20   ;;  %s1642_s19 = sphi %s1694_s19, %s2042_s19   ;;  %s1638_s18 = sphi %s1692_s18, %s2041_s18  }
   0x5   : > { %s30_s26 = sadd.s32 1, %s1654_s22  ;;  %s151_s27 = sadd.s32 1, %s1646_s20 }
   0x6   : > { %p32_p0 = scmp.ge.s32.totalorder %s30_s26, 2  ;;  %p161_p1 = scmp.ne.s32.totalorder %s1646_s20, %s1642_s19 }
   0x7   : > { %p162_p2 = scmp.eq.s32.totalorder %s1384_s24, 1  ;;  %p167_p3 = scmp.ne.s32.totalorder %s1642_s19, %s1638_s18 }
   0x8   : > { %s2047_s26 = smov (%p32_p0, %s30_s26), 0  ;;  %p168_p5 = scmp.eq.s32.totalorder %s1385_s25, 1 }
   0x9   : > { %p1732_p4 = por %p162_p2, %p161_p1  ;;  %s146_s29 = ssub.s32 %s1654_s22, %s2047_s26 }
   0xa   : > { %p1388_p6 = scmp.ge.s32.totalorder %s1658_s23, 1  ;;  %p149_p7 = scmp.eq.s32.totalorder %s146_s29, 0 }
   0xb   : > { %p1739_p8 = por %p168_p5, %p167_p3  ;;  %p211_p9 = scmp.lt.s32.totalorder %s1658_s23, 3 }
   0xc   : > { %s1745_s6 = scalar_select %p149_p7, %s1646_s20, %s151_s27  }
   0xd   : > { %p212_p10 = pnand %p1388_p6, %p211_p9 }
   0xe   : > { %p244_p11 = scmp.lt.s32.totalorder (!%p212_p10), %s1650_s21, 1  ;;  %s1491_s9 = sshll.u32 (!%p212_p10), %s1650_s21, 8 }
   0xf   : > { %215 = sbr.rel (%p212_p10) target bundleno = 2082 (0x822), region = 40  ;;  %s1306_s14 = scalar_lea.hbm (!%p212_p10), %s2038_s5, %s1491_s9 }
  0x14   : > { %v1660_v0 = vmov 0   ;;  %s245_s7 = scalar_select %p244_p11, %s1650_s21, 1  ;;  %v265_v1 = vld [vmem:[%s2035_s2 + $0x10] sm:$0xff]  ;;  %v263_v2 = vld [vmem:[%s2035_s2] sm:$0xff]  ;;  %v266_v3 = vld [vmem:[%s2035_s2 + $0x18] sm:$0xff]  ;;  %vm317_vm0 = vcmask 261120  }
  0x15   : > { %356 = vmatprep.mubr.bf16.mxu0 %v1660_v0  ;;  %1548 = vset.pattern.permute.xlu0 %v1660_v0  ;;  %v264_v4 = vld [vmem:[%s2035_s2 + $0x8] sm:$0xff]  ;;  %v1406_v12 = vld [vmem:[%s2035_s2 + $0x30] sm:$0xff]  ;;  %v1407_v13 = vld [vmem:[%s2035_s2 + $0x38] sm:$0xff] }
  0x16   : > { %1549 = vset.pattern.permute.xlu1 %v1660_v0  ;;  %467 = vmatprep.mubr.bf16.mxu1 %v1660_v0  ;;  %s1490_s12 = sshll.u32 %s245_s7, 5  ;;  %v1404_v15 = vld [vmem:[%s2035_s2 + $0x20] sm:$0xff]  ;;  %v1405_v17 = vld [vmem:[%s2035_s2 + $0x28] sm:$0xff]  ;;  %v1418_v18 = vld [vmem:[%s2035_s2 + $0x50] sm:$0xff]  ;;  %s240_s7 = sand.u32 1, %s1642_s19  }
  0x17   : > { %279 = vperm.xlu0 %1548, %v265_v1   ;;  %269 = vperm.xlu1 %1549, %v263_v2   ;;  %s251_s17 = scalar_lea.vmem %s2033_s0, %s1490_s12  ;;  %v1554_v16 = vld [vmem:[%s2034_s1] sm:$0xff]   ;;  %v1419_v19 = vld [vmem:[%s2035_s2 + $0x58] sm:$0xff]  ;;  %v1555_v21 = vld [vmem:[%s2034_s1 + $0x8] sm:$0xff]   ;;  %s1389_s8 = sshll.u32 %s240_s7, 4 }
  0x18   : > { %v1768_v5 = vld [vmem:[%s251_s17 + $0x10] sm:$0xff]  ;;  %v1770_v6 = vld [vmem:[%s251_s17 + $0x18] sm:$0xff]  ;;  %v1772_v7 = vld [vmem:[%s251_s17] sm:$0xff]  ;;  %s242_s10 = scalar_lea.vmem [#allocation2], %s1389_s8  ;;  %s1292_s15 = scalar_lea.sflag [#allocation3], %s240_s7 }
  0x19   : > { %v1397_v8 = vcombine.high %v1768_v5, %v1770_v6  ;;  %v1396_v9 = vcombine.low %v1768_v5, %v1770_v6  ;;  %v1778_v10 = vld [vmem:[%s251_s17 + $0x8] sm:$0xff]  ;;  %v1416_v20 = vld [vmem:[%s2035_s2 + $0x40] sm:$0xff]  ;;  %v1430_v23 = vld [vmem:[%s2035_s2 + $0x70] sm:$0xff]  ;;  %s1308_s11 = sshll.u32 %s242_s10, 4  ;;  %s1661_s17 = smov [#allocation2]   ;;  %s1309_s11 = int_to_ptr.vmem [resolvable:$true] %s1308_s11 }
  0x1a   : > { %v1395_v11 = vcombine.high %v1772_v7, %v1778_v10  ;;  %v1394_v14 = vcombine.low %v1772_v7, %v1778_v10  ;;  %v1417_v22 = vld [vmem:[%s2035_s2 + $0x48] sm:$0xff]  ;;  %v1431_v24 = vld [vmem:[%s2035_s2 + $0x78] sm:$0xff]  ;;  %v1428_v25 = vld [vmem:[%s2035_s2 + $0x60] sm:$0xff]  ;;  %s1582_s16 = scalar_lea.vmem %s1309_s11, 256  ;;  %s1586_s21 = sshll.u32 %s1661_s17, 4  ;;  %s1587_s21 = int_to_ptr.vmem [resolvable:$false] %s1586_s21 }
  0x1b   : > { %284 = vperm.xlu0 %1548, %v266_v3   ;;  %274 = vperm.xlu1 %1549, %v264_v4   ;;  %v1429_v26 = vld [vmem:[%s2035_s2 + $0x68] sm:$0xff]  ;;  %v1442_v27 = vld [vmem:[%s2035_s2 + $0x90] sm:$0xff]  ;;  %v1443_v28 = vld [vmem:[%s2035_s2 + $0x98] sm:$0xff]  ;;  %p1583_p12 = scmp.ne.s32.totalorder %s1309_s11, %s1582_s16  ;;  %s1588_s24 = scalar_lea.vmem %s1587_s21, 512 }
  0x1c   : > { %336 = vmatprep.subr.bf16.mxu0 %v1397_v8  ;;  %v1440_v29 = vld [vmem:[%s2035_s2 + $0x80] sm:$0xff]  ;;  %v1441_v30 = vld [vmem:[%s2035_s2 + $0x88] sm:$0xff]  ;;  %v1454_v31 = vld [vmem:[%s2035_s2 + $0xb0] sm:$0xff]  ;;  %p1589_p1 = scmp.lt.s32.totalorder %s1309_s11, %s1587_s21  ;;  %p1590_p2 = scmp.lt.s32.totalorder %s1588_s24, %s1582_s16 }
  0x1d   : > { %337 = vmatpush1.bf16.msra.mxu0 %v1396_v9  ;;  %v1455_v32 = vld [vmem:[%s2035_s2 + $0xb8] sm:$0xff]  ;;  %v1452_v33 = vld [vmem:[%s2035_s2 + $0xa0] sm:$0xff]  ;;  %v1453_v34 = vld [vmem:[%s2035_s2 + $0xa8] sm:$0xff]  ;;  %p1584_p13 = pnand %p1583_p12, %p1732_p4 }
  0x1e   : > { %338 = vmatprep.subr.bf16.mxu0 %v1395_v11  ;;  %v1466_v35 = vld [vmem:[%s2035_s2 + $0xd0] sm:$0xff]  ;;  %v1467_v36 = vld [vmem:[%s2035_s2 + $0xd8] sm:$0xff]  ;;  %v1464_v37 = vld [vmem:[%s2035_s2 + $0xc0] sm:$0xff]  ;;  %p1591_p3 = por %p1590_p2, %p1589_p1 }
  0x1f   : > { %411 = vperm.xlu0 %1548, %v1406_v12   ;;  %416 = vperm.xlu1 %1549, %v1407_v13   ;;  %v1465_v38 = vld [vmem:[%s2035_s2 + $0xc8] sm:$0xff]  ;;  %v1478_v39 = vld [vmem:[%s2035_s2 + $0xf0] sm:$0xff]  ;;  %v1479_v40 = vld [vmem:[%s2035_s2 + $0xf8] sm:$0xff]  ;;  %p1585_p0 = pneg %p1584_p13 }
  0x20   : > { %v1476_v41 = vld [vmem:[%s2035_s2 + $0xe0] sm:$0xff]  ;;  %v1477_v42 = vld [vmem:[%s2035_s2 + $0xe8] sm:$0xff] }
  0x21   : > { %339 = vmatpush1.bf16.msra.mxu0 %v1394_v14  ;;  %v1191_v43 = vld [vmem:[%s2037_s4] sm:$0xff]  ;;  %p1592_p5 = pnand %p1591_p3, %p1585_p0 }
  0x23   : > { %401 = vperm.xlu0 %1548, %v1404_v15   ;;  %406 = vperm.xlu1 %1549, %v1405_v17   ;;  %v1556_v17 = vld [vmem:[%s2034_s1 + $0x10] sm:$0xff]  }
  0x24   : > { %1398 = vmatmul.mubr.msk.bf16.vlgmr.msra.gmra.mxu0 %vm317_vm0, %v1554_v16 }
  0x25   : > { %366 = vmatprep.mubr.bf16.mxu0 %v1660_v0 }
  0x27   : > { %522 = vperm.xlu0 %1548, %v1418_v18   ;;  %527 = vperm.xlu1 %1549, %v1419_v19   ;;  %v1557_v18 = vld [vmem:[%s2034_s1 + $0x18] sm:$0xff]  }
  0x2b   : > { %512 = vperm.xlu0 %1548, %v1416_v20   ;;  %517 = vperm.xlu1 %1549, %v1417_v22  }
  0x2c   : > { %1399 = vmatmul.mubr.msk.bf16.gmra.mxu0 %vm317_vm0, %v1555_v21 }
  0x2d   : > { %578 = vmatprep.mubr.bf16.mxu0 %v1660_v0 }
  0x2f   : > { %649 = vperm.xlu0 %1548, %v1430_v23   ;;  %654 = vperm.xlu1 %1549, %v1431_v24  }
  0x33   : > { %639 = vperm.xlu0 %1548, %v1428_v25   ;;  %644 = vperm.xlu1 %1549, %v1429_v26  }
  0x37   : > { %760 = vperm.xlu0 %1548, %v1442_v27   ;;  %765 = vperm.xlu1 %1549, %v1443_v28  }
  0x3b   : > { %750 = vperm.xlu0 %1548, %v1440_v29   ;;  %755 = vperm.xlu1 %1549, %v1441_v30  }
  0x3f   : > { %871 = vperm.xlu0 %1548, %v1454_v31   ;;  %876 = vperm.xlu1 %1549, %v1455_v32  }
  0x43   : > { %861 = vperm.xlu0 %1548, %v1452_v33   ;;  %866 = vperm.xlu1 %1549, %v1453_v34  }
  0x47   : > { %990 = vperm.xlu0 %1548, %v1466_v35   ;;  %995 = vperm.xlu1 %1549, %v1467_v36  }
  0x4b   : > { %980 = vperm.xlu0 %1548, %v1464_v37   ;;  %985 = vperm.xlu1 %1549, %v1465_v38  }
  0x4f   : > { %1101 = vperm.xlu0 %1548, %v1478_v39   ;;  %1106 = vperm.xlu1 %1549, %v1479_v40  }
  0x53   : > { %1091 = vperm.xlu0 %1548, %v1476_v41   ;;  %1096 = vperm.xlu1 %1549, %v1477_v42  }
  0x57   : > { %1194 = vperm.xlu0 %1548, %v1191_v43  }
  0x92   : > { %v280_v47 = vpop.permute.xlu0 %279  ;;  %v270_v48 = vpop.permute.xlu1 %269 }
  0x96   : > { %v285_v52 = vpop.permute.xlu0 %284  ;;  %v275_v53 = vpop.permute.xlu1 %274 }
  0x9a   : > { %v417_v22 = vpop.permute.xlu1 %416  ;;  %v412_v24 = vpop.permute.xlu0 %411 }
  0x9e   : > { %v407_v27 = vpop.permute.xlu1 %406  ;;  %v402_v32 = vpop.permute.xlu0 %401 }
  0xe4   : > { %v358_v44 = vpop.f32.mrf.mxu0 }
  0xe5   : > { %v359_v4 = vadd.f32 %v358_v44, %v270_v48 }
  0xe6   : > { %v360_v45 = vpop.f32.mrf.mxu0 }
  0xe7   : > { %v361_v60 = vadd.f32 %v360_v45, %v270_v48  ;;  %v377_v15 = vmax.f32 %v359_v4, 0.0 }
  0xe8   : > { %v362_v46 = vpop.f32.mrf.mxu0 }
  0xe9   : > { %v363_v62 = vadd.f32 %v362_v46, %v275_v53  ;;  %v378_v9 = vmax.f32 %v361_v60, 0.0 }
  0xea   : > { %v364_v49 = vpop.f32.mrf.mxu0 }
  0xeb   : > { %v365_v55 = vadd.f32 %v364_v49, %v275_v53  ;;  %v379_v12 = vmax.f32 %v363_v62, 0.0 }
  0xec   : > { %v368_v50 = vpop.f32.mrf.mxu0 }
  0xed   : > { %v369_v58 = vadd.f32 %v368_v50, %v280_v47  ;;  %v380_v1 = vmax.f32 %v365_v55, 0.0  ;;  %v385_v16 = vpack.c.bf16 %v379_v12, %v377_v15  ;;  %v528_v55 = vpop.permute.xlu1 %527  ;;  %v612_v12 = vunpack.c.h.bf16 %v1768_v5 }
  0xee   : > { %v370_v51 = vpop.f32.mrf.mxu0  ;;  %v614_v15 = vunpack.c.h.bf16 %v1770_v6 }
  0xef   : > { %v371_v56 = vadd.f32 %v370_v51, %v280_v47  ;;  %v381_v8 = vmax.f32 %v369_v58, 0.0  ;;  %v386_v14 = vpack.c.bf16 %v380_v1, %v378_v9  ;;  %v1558_v51 = vld [vmem:[%s2034_s1 + $0x20] sm:$0xff]  }
  0xf0   : > { %v372_v54 = vpop.f32.mrf.mxu0 }
  0xf1   : > { %v373_v57 = vadd.f32 %v372_v54, %v285_v52  ;;  %v382_v2 = vmax.f32 %v371_v56, 0.0  ;;  %v518_v60 = vpop.permute.xlu1 %517 }
  0xf2   : > { %v374_v59 = vpop.f32.mrf.mxu0 }
  0xf3   : > { %v375_v61 = vadd.f32 %v374_v59, %v285_v52  ;;  %v383_v63 = vmax.f32 %v373_v57, 0.0  ;;  %v1559_v52 = vld [vmem:[%s2034_s1 + $0x28] sm:$0xff]   ;;  %v523_v57 = vpop.permute.xlu0 %522 }
  0xf5   : > { %v384_v3 = vmax.f32 %v375_v61, 0.0  ;;  %v387_v13 = vpack.c.bf16 %v383_v63, %v381_v8  ;;  %v610_v8 = vunpack.c.h.bf16 %v1778_v10 }
  0xf7   : > { %v388_v11 = vpack.c.bf16 %v384_v3, %v382_v2  ;;  %v513_v1 = vpop.permute.xlu0 %512 }
  0xf9   : > { %447 = vmatprep.subr.bf16.mxu1 %v388_v11 }
  0xfa   : > { %448 = vmatpush1.bf16.msra.mxu1 %v387_v13  ;;  %v613_v13 = vunpack.c.l.bf16 %v1770_v6 }
  0xfb   : > { %449 = vmatprep.subr.bf16.mxu1 %v386_v14 }
  0xfe   : > { %450 = vmatpush1.bf16.msra.mxu1 %v385_v16 }
 0x101   : > { %1410 = vmatmul.mubr.msk.bf16.vlgmr.msra.gmra.mxu1 %vm317_vm0, %v1556_v17 }
 0x102   : > { %477 = vmatprep.mubr.bf16.mxu1 %v1660_v0 }
 0x109   : > { %1411 = vmatmul.mubr.msk.bf16.gmra.mxu1 %vm317_vm0, %v1557_v18 }
 0x10a   : > { %705 = vmatprep.mubr.bf16.mxu1 %v1660_v0 }
 0x1c1   : > { %v469_v19 = vpop.f32.mrf.mxu1 }
 0x1c2   : > { %v470_v42 = vadd.f32 %v469_v19, %v402_v32 }
 0x1c3   : > { %v471_v20 = vpop.f32.mrf.mxu1 }
 0x1c4   : > { %v472_v35 = vadd.f32 %v471_v20, %v402_v32  ;;  %v488_v49 = vmax.f32 %v470_v42, 0.0  ;;  %v607_v32 = vunpack.c.l.bf16 %v1772_v7 }
 0x1c5   : > { %v473_v21 = vpop.f32.mrf.mxu1 }
 0x1c6   : > { %v474_v37 = vadd.f32 %v473_v21, %v407_v27  ;;  %v489_v44 = vmax.f32 %v472_v35, 0.0 }
 0x1c7   : > { %v475_v23 = vpop.f32.mrf.mxu1 }
 0x1c8   : > { %v476_v29 = vadd.f32 %v475_v23, %v407_v27  ;;  %v490_v46 = vmax.f32 %v474_v37, 0.0  ;;  %v609_v27 = vunpack.c.l.bf16 %v1778_v10 }
 0x1c9   : > { %v479_v25 = vpop.f32.mrf.mxu1 }
 0x1ca   : > { %v480_v33 = vadd.f32 %v479_v25, %v412_v24  ;;  %v491_v39 = vmax.f32 %v476_v29, 0.0  ;;  %v496_v50 = vpack.c.bf16 %v490_v46, %v488_v49 }
 0x1cb   : > { %v481_v26 = vpop.f32.mrf.mxu1 }
 0x1cc   : > { %v482_v30 = vadd.f32 %v481_v26, %v412_v24  ;;  %v492_v43 = vmax.f32 %v480_v33, 0.0  ;;  %v497_v48 = vpack.c.bf16 %v491_v39, %v489_v44  ;;  %v608_v24 = vunpack.c.h.bf16 %v1772_v7  ;;  %v1561_v39 = vld [vmem:[%s2034_s1 + $0x38] sm:$0xff]  }
 0x1cd   : > { %v483_v28 = vpop.f32.mrf.mxu1 }
 0x1ce   : > { %v484_v31 = vadd.f32 %v483_v28, %v417_v22  ;;  %v493_v40 = vmax.f32 %v482_v30, 0.0 }
 0x1cf   : > { %v485_v34 = vpop.f32.mrf.mxu1 }
 0x1d0   : > { %v486_v36 = vadd.f32 %v485_v34, %v417_v22  ;;  %v494_v38 = vmax.f32 %v484_v31, 0.0  ;;  %v611_v22 = vunpack.c.l.bf16 %v1768_v5 }
 0x1d2   : > { %v495_v41 = vmax.f32 %v486_v36, 0.0  ;;  %v498_v47 = vpack.c.bf16 %v494_v38, %v492_v43  ;;  %v1560_v38 = vld [vmem:[%s2034_s1 + $0x30] sm:$0xff]   ;;  %v655_v43 = vpop.permute.xlu1 %654 }
 0x1d4   : > { %v499_v45 = vpack.c.bf16 %v495_v41, %v493_v40 }
 0x1d6   : > { %558 = vmatprep.subr.bf16.mxu0 %v499_v45  ;;  %v650_v45 = vpop.permute.xlu0 %649 }
 0x1d7   : > { %559 = vmatpush1.bf16.msra.mxu0 %v498_v47 }
 0x1d8   : > { %560 = vmatprep.subr.bf16.mxu0 %v497_v48  ;;  %v645_v48 = vpop.permute.xlu1 %644 }
 0x1db   : > { %561 = vmatpush1.bf16.msra.mxu0 %v496_v50 }
 0x1de   : > { %1422 = vmatmul.mubr.msk.bf16.vlgmr.msra.gmra.mxu0 %vm317_vm0, %v1558_v51 }
 0x1df   : > { %588 = vmatprep.mubr.bf16.mxu0 %v1660_v0 }
 0x1e6   : > { %1423 = vmatmul.mubr.msk.bf16.gmra.mxu0 %vm317_vm0, %v1559_v52 }
 0x1e7   : > { %816 = vmatprep.mubr.bf16.mxu0 %v1660_v0 }
 0x29e   : > { %v580_v53 = vpop.f32.mrf.mxu0 }
 0x29f   : > { %v581_v20 = vadd.f32 %v580_v53, %v513_v1  ;;  %v640_v53 = vpop.permute.xlu0 %639 }
 0x2a0   : > { %v582_v54 = vpop.f32.mrf.mxu0 }
 0x2a1   : > { %v583_v4 = vadd.f32 %v582_v54, %v513_v1  ;;  %v599_v31 = vmax.f32 %v581_v20, 0.0 }
 0x2a2   : > { %v584_v56 = vpop.f32.mrf.mxu0 }
 0x2a3   : > { %v585_v11 = vadd.f32 %v584_v56, %v518_v60  ;;  %v600_v23 = vmax.f32 %v583_v4, 0.0  ;;  %v1929_v37 = vadd.f32 %v607_v32, %v599_v31  ;;  %v761_v20 = vpop.permute.xlu0 %760 }
 0x2a4   : > { %v586_v58 = vpop.f32.mrf.mxu0 }
 0x2a5   : > { %v587_v62 = vadd.f32 %v586_v58, %v518_v60  ;;  %v601_v26 = vmax.f32 %v585_v11, 0.0  ;;  %v1919_v5 = vadd.f32 %v608_v24, %v600_v23 }
 0x2a6   : > { %v590_v59 = vpop.f32.mrf.mxu0 }
 0x2a7   : > { %v591_v2 = vadd.f32 %v590_v59, %v523_v57  ;;  %v602_v16 = vmax.f32 %v587_v62, 0.0  ;;  %v1923_v35 = vadd.f32 %v609_v27, %v601_v26  ;;  %v751_v31 = vpop.permute.xlu0 %750 }
 0x2a8   : > { %v592_v61 = vpop.f32.mrf.mxu0 }
 0x2a9   : > { %v593_v63 = vadd.f32 %v592_v61, %v523_v57  ;;  %v603_v21 = vmax.f32 %v591_v2, 0.0  ;;  %v1910_v29 = vadd.f32 %v610_v8, %v602_v16  ;;  %v623_v7 = vpack.c.bf16 %v1923_v35, %v1929_v37 }
 0x2aa   : > { %v594_v3 = vpop.f32.mrf.mxu0 }
 0x2ab   : > { %v595_v9 = vadd.f32 %v594_v3, %v528_v55  ;;  %v604_v17 = vmax.f32 %v593_v63, 0.0  ;;  %v1917_v33 = vadd.f32 %v611_v22, %v603_v21  ;;  %v624_v36 = vpack.c.bf16 %v1910_v29, %v1919_v5 }
 0x2ac   : > { %v596_v14 = vpop.f32.mrf.mxu0 }
 0x2ad   : > { %v605_v18 = vmax.f32 %v595_v9, 0.0  ;;  %v597_v19 = vadd.f32 %v596_v14, %v528_v55  ;;  %v1912_v6 = vadd.f32 %v612_v12, %v604_v17  ;;  %v1563_v14 = vld [vmem:[%s2034_s1 + $0x48] sm:$0xff]  }
 0x2af   : > { %v606_v25 = vmax.f32 %v597_v19, 0.0  ;;  %v1908_v28 = vadd.f32 %v613_v13, %v605_v18  ;;  %v1562_v13 = vld [vmem:[%s2034_s1 + $0x40] sm:$0xff]   ;;  %v766_v18 = vpop.permute.xlu1 %765 }
 0x2b1   : > { %v1914_v30 = vadd.f32 %v614_v15, %v606_v25  ;;  %v625_v10 = vpack.c.bf16 %v1908_v28, %v1917_v33 }
 0x2b3   : > { %v626_v34 = vpack.c.bf16 %v1914_v30, %v1912_v6  ;;  %v756_v23 = vpop.permute.xlu1 %755 }
 0x2b5   : > { %685 = vmatprep.subr.bf16.mxu1 %v626_v34 }
 0x2b6   : > { %686 = vmatpush1.bf16.msra.mxu1 %v625_v10 }
 0x2b7   : > { %687 = vmatprep.subr.bf16.mxu1 %v624_v36 }
 0x2ba   : > { %688 = vmatpush1.bf16.msra.mxu1 %v623_v7 }
 0x2bd   : > { %1434 = vmatmul.mubr.msk.bf16.vlgmr.msra.gmra.mxu1 %vm317_vm0, %v1560_v38 }
 0x2be   : > { %715 = vmatprep.mubr.bf16.mxu1 %v1660_v0 }
 0x2c5   : > { %1435 = vmatmul.mubr.msk.bf16.gmra.mxu1 %vm317_vm0, %v1561_v39 }
 0x2c6   : > { %927 = vmatprep.mubr.bf16.mxu1 %v1660_v0 }
 0x37d   : > { %v707_v40 = vpop.f32.mrf.mxu1 }
 0x37e   : > { %v708_v63 = vadd.f32 %v707_v40, %v640_v53 }
 0x37f   : > { %v709_v41 = vpop.f32.mrf.mxu1 }
 0x380   : > { %v710_v56 = vadd.f32 %v709_v41, %v640_v53  ;;  %v726_v11 = vmax.f32 %v708_v63, 0.0 }
 0x381   : > { %v711_v42 = vpop.f32.mrf.mxu1 }
 0x382   : > { %v712_v58 = vadd.f32 %v711_v42, %v645_v48  ;;  %v727_v2 = vmax.f32 %v710_v56, 0.0 }
 0x383   : > { %v713_v44 = vpop.f32.mrf.mxu1 }
 0x384   : > { %v714_v50 = vadd.f32 %v713_v44, %v645_v48  ;;  %v728_v4 = vmax.f32 %v712_v58, 0.0 }
 0x385   : > { %v717_v46 = vpop.f32.mrf.mxu1 }
 0x386   : > { %v718_v54 = vadd.f32 %v717_v46, %v650_v45  ;;  %v729_v60 = vmax.f32 %v714_v50, 0.0  ;;  %v734_v12 = vpack.c.bf16 %v728_v4, %v726_v11 }
 0x387   : > { %v719_v47 = vpop.f32.mrf.mxu1 }
 0x388   : > { %v720_v51 = vadd.f32 %v719_v47, %v650_v45  ;;  %v730_v1 = vmax.f32 %v718_v54, 0.0  ;;  %v735_v9 = vpack.c.bf16 %v729_v60, %v727_v2 }
 0x389   : > { %v721_v49 = vpop.f32.mrf.mxu1 }
 0x38a   : > { %v722_v52 = vadd.f32 %v721_v49, %v655_v43  ;;  %v731_v61 = vmax.f32 %v720_v51, 0.0  ;;  %v1564_v51 = vld [vmem:[%s2034_s1 + $0x50] sm:$0xff]  }
 0x38b   : > { %v723_v55 = vpop.f32.mrf.mxu1 }
 0x38c   : > { %v724_v57 = vadd.f32 %v723_v55, %v655_v43  ;;  %v732_v59 = vmax.f32 %v722_v52, 0.0  ;;  %v1565_v52 = vld [vmem:[%s2034_s1 + $0x58] sm:$0xff]   ;;  %v877_v55 = vpop.permute.xlu1 %876 }
 0x38e   : > { %v733_v62 = vmax.f32 %v724_v57, 0.0  ;;  %v736_v8 = vpack.c.bf16 %v732_v59, %v730_v1  ;;  %v872_v57 = vpop.permute.xlu0 %871 }
 0x390   : > { %v737_v3 = vpack.c.bf16 %v733_v62, %v731_v61  ;;  %v867_v60 = vpop.permute.xlu1 %866 }
 0x392   : > { %796 = vmatprep.subr.bf16.mxu0 %v737_v3  ;;  %v862_v1 = vpop.permute.xlu0 %861 }
 0x393   : > { %797 = vmatpush1.bf16.msra.mxu0 %v736_v8 }
 0x394   : > { %798 = vmatprep.subr.bf16.mxu0 %v735_v9 }
 0x397   : > { %799 = vmatpush1.bf16.msra.mxu0 %v734_v12 }
 0x39a   : > { %1446 = vmatmul.mubr.msk.bf16.vlgmr.msra.gmra.mxu0 %vm317_vm0, %v1562_v13 }
 0x39b   : > { %826 = vmatprep.mubr.bf16.mxu0 %v1660_v0 }
 0x3a2   : > { %1447 = vmatmul.mubr.msk.bf16.gmra.mxu0 %vm317_vm0, %v1563_v14 }
 0x3a3   : > { %1046 = vmatprep.mubr.bf16.mxu0 %v1660_v0 }
 0x45a   : > { %v818_v15 = vpop.f32.mrf.mxu0 }
 0x45b   : > { %v819_v42 = vadd.f32 %v818_v15, %v751_v31 }
 0x45c   : > { %v820_v16 = vpop.f32.mrf.mxu0 }
 0x45d   : > { %v821_v10 = vadd.f32 %v820_v16, %v751_v31  ;;  %v837_v49 = vmax.f32 %v819_v42, 0.0 }
 0x45e   : > { %v822_v17 = vpop.f32.mrf.mxu0 }
 0x45f   : > { %v823_v7 = vadd.f32 %v822_v17, %v756_v23  ;;  %v838_v44 = vmax.f32 %v821_v10, 0.0 }
 0x460   : > { %v824_v19 = vpop.f32.mrf.mxu0 }
 0x461   : > { %v825_v25 = vadd.f32 %v824_v19, %v756_v23  ;;  %v839_v46 = vmax.f32 %v823_v7, 0.0  ;;  %v991_v7 = vpop.permute.xlu0 %990 }
 0x462   : > { %v828_v21 = vpop.f32.mrf.mxu0 }
 0x463   : > { %v829_v32 = vadd.f32 %v828_v21, %v761_v20  ;;  %v840_v39 = vmax.f32 %v825_v25, 0.0  ;;  %v845_v50 = vpack.c.bf16 %v839_v46, %v837_v49 }
 0x464   : > { %v830_v22 = vpop.f32.mrf.mxu0 }
 0x465   : > { %v831_v26 = vadd.f32 %v830_v22, %v761_v20  ;;  %v841_v43 = vmax.f32 %v829_v32, 0.0  ;;  %v846_v48 = vpack.c.bf16 %v840_v39, %v838_v44 }
 0x466   : > { %v832_v24 = vpop.f32.mrf.mxu0 }
 0x467   : > { %v833_v27 = vadd.f32 %v832_v24, %v766_v18  ;;  %v842_v40 = vmax.f32 %v831_v26, 0.0 }
 0x468   : > { %v834_v34 = vpop.f32.mrf.mxu0 }
 0x469   : > { %v835_v36 = vadd.f32 %v834_v34, %v766_v18  ;;  %v843_v38 = vmax.f32 %v833_v27, 0.0 }
 0x46b   : > { %v844_v41 = vmax.f32 %v835_v36, 0.0  ;;  %v847_v47 = vpack.c.bf16 %v843_v38, %v841_v43 }
 0x46d   : > { %v848_v45 = vpack.c.bf16 %v844_v41, %v842_v40 }
 0x46f   : > { %907 = vmatprep.subr.bf16.mxu1 %v848_v45  ;;  %v981_v45 = vpop.permute.xlu0 %980 }
 0x470   : > { %908 = vmatpush1.bf16.msra.mxu1 %v847_v47 }
 0x471   : > { %909 = vmatprep.subr.bf16.mxu1 %v846_v48 }
 0x474   : > { %910 = vmatpush1.bf16.msra.mxu1 %v845_v50 }
 0x477   : > { %1458 = vmatmul.mubr.msk.bf16.vlgmr.msra.gmra.mxu1 %vm317_vm0, %v1564_v51 }
 0x478   : > { %937 = vmatprep.mubr.bf16.mxu1 %v1660_v0 }
 0x47f   : > { %1459 = vmatmul.mubr.msk.bf16.gmra.mxu1 %vm317_vm0, %v1565_v52 }
 0x480   : > { %1157 = vmatprep.mubr.bf16.mxu1 %v1660_v0 }
 0x537   : > { %v929_v53 = vpop.f32.mrf.mxu1 }
 0x538   : > { %v930_v16 = vadd.f32 %v929_v53, %v862_v1 }
 0x539   : > { %v931_v54 = vpop.f32.mrf.mxu1 }
 0x53a   : > { %v932_v4 = vadd.f32 %v931_v54, %v862_v1  ;;  %v948_v25 = vmax.f32 %v930_v16, 0.0  ;;  %v1568_v1 = vld [vmem:[%s2034_s1 + $0x70] sm:$0xff]  }
 0x53b   : > { %v933_v56 = vpop.f32.mrf.mxu1 }
 0x53c   : > { %v934_v9 = vadd.f32 %v933_v56, %v867_v60  ;;  %v949_v18 = vmax.f32 %v932_v4, 0.0  ;;  %v956_v36 = vadd.f32 %v948_v25, %v1929_v37 }
 0x53d   : > { %v935_v58 = vpop.f32.mrf.mxu1 }
 0x53e   : > { %v936_v62 = vadd.f32 %v935_v58, %v867_v60  ;;  %v950_v20 = vmax.f32 %v934_v9, 0.0  ;;  %v957_v27 = vadd.f32 %v949_v18, %v1919_v5 }
 0x53f   : > { %v939_v59 = vpop.f32.mrf.mxu1 }
 0x540   : > { %v940_v2 = vadd.f32 %v939_v59, %v872_v57  ;;  %v951_v12 = vmax.f32 %v936_v62, 0.0  ;;  %v958_v32 = vadd.f32 %v950_v20, %v1923_v35  ;;  %v996_v35 = vpop.permute.xlu1 %995 }
 0x541   : > { %v941_v61 = vpop.f32.mrf.mxu1 }
 0x542   : > { %v942_v63 = vadd.f32 %v941_v61, %v872_v57  ;;  %v952_v17 = vmax.f32 %v940_v2, 0.0  ;;  %v959_v22 = vadd.f32 %v951_v12, %v1910_v29  ;;  %v1566_v29 = vld [vmem:[%s2034_s1 + $0x60] sm:$0xff]   ;;  %v1569_v2 = vld [vmem:[%s2034_s1 + $0x78] sm:$0xff]   ;;  %v1102_v12 = vpop.permute.xlu0 %1101 }
 0x543   : > { %v943_v3 = vpop.f32.mrf.mxu1 }
 0x544   : > { %v944_v8 = vadd.f32 %v943_v3, %v877_v55  ;;  %v953_v13 = vmax.f32 %v942_v63, 0.0  ;;  %v960_v26 = vadd.f32 %v952_v17, %v1917_v33  ;;  %v965_v10 = vpack.c.bf16 %v959_v22, %v957_v27  ;;  %v986_v40 = vpop.permute.xlu1 %985 }
 0x545   : > { %v945_v11 = vpop.f32.mrf.mxu1 }
 0x546   : > { %v954_v14 = vmax.f32 %v944_v8, 0.0  ;;  %v946_v15 = vadd.f32 %v945_v11, %v877_v55  ;;  %v961_v23 = vadd.f32 %v953_v13, %v1912_v6  ;;  %v1567_v6 = vld [vmem:[%s2034_s1 + $0x68] sm:$0xff]  }
 0x548   : > { %v955_v19 = vmax.f32 %v946_v15, 0.0  ;;  %v962_v21 = vadd.f32 %v954_v14, %v1908_v28  ;;  %v964_v28 = vpack.c.bf16 %v958_v32, %v956_v36  ;;  %v1107_v9 = vpop.permute.xlu1 %1106 }
 0x54a   : > { %v963_v24 = vadd.f32 %v955_v19, %v1914_v30  ;;  %v966_v34 = vpack.c.bf16 %v962_v21, %v960_v26 }
 0x54c   : > { %v967_v31 = vpack.c.bf16 %v963_v24, %v961_v23  ;;  %v1097_v15 = vpop.permute.xlu1 %1096 }
 0x54e   : > { %1026 = vmatprep.subr.bf16.mxu0 %v967_v31 }
 0x54f   : > { %1027 = vmatpush1.bf16.msra.mxu0 %v966_v34 }
 0x550   : > { %1028 = vmatprep.subr.bf16.mxu0 %v965_v10 }
 0x553   : > { %1029 = vmatpush1.bf16.msra.mxu0 %v964_v28 }
 0x556   : > { %1470 = vmatmul.mubr.msk.bf16.vlgmr.msra.gmra.mxu0 %vm317_vm0, %v1566_v29 }
 0x557   : > { %1056 = vmatprep.mubr.bf16.mxu0 %v1660_v0 }
 0x55e   : > { %1471 = vmatmul.mubr.msk.bf16.gmra.mxu0 %vm317_vm0, %v1567_v6 }
 0x55f   : > { %1232 = vmatprep.mubr.bf16.mxu0 %v1660_v0 }
 0x616   : > { %v1048_v30 = vpop.f32.mrf.mxu0 }
 0x617   : > { %v1049_v55 = vadd.f32 %v1048_v30, %v981_v45 }
 0x618   : > { %v1050_v33 = vpop.f32.mrf.mxu0 }
 0x619   : > { %v1051_v48 = vadd.f32 %v1050_v33, %v981_v45  ;;  %v1067_v62 = vmax.f32 %v1049_v55, 0.0 }
 0x61a   : > { %v1052_v5 = vpop.f32.mrf.mxu0 }
 0x61b   : > { %v1053_v50 = vadd.f32 %v1052_v5, %v986_v40  ;;  %v1068_v57 = vmax.f32 %v1051_v48, 0.0  ;;  %v1190_v5 = vld [vmem:[%s2036_s3] sm:$0xf] }
 0x61c   : > { %v1054_v37 = vpop.f32.mrf.mxu0 }
 0x61d   : > { %v1055_v42 = vadd.f32 %v1054_v37, %v986_v40  ;;  %v1069_v59 = vmax.f32 %v1053_v50, 0.0 }
 0x61e   : > { %v1058_v38 = vpop.f32.mrf.mxu0 }
 0x61f   : > { %v1059_v46 = vadd.f32 %v1058_v38, %v991_v7  ;;  %v1070_v52 = vmax.f32 %v1055_v42, 0.0  ;;  %v1075_v63 = vpack.c.bf16 %v1069_v59, %v1067_v62 }
 0x620   : > { %v1060_v39 = vpop.f32.mrf.mxu0 }
 0x621   : > { %v1061_v43 = vadd.f32 %v1060_v39, %v991_v7  ;;  %v1071_v56 = vmax.f32 %v1059_v46, 0.0  ;;  %v1076_v61 = vpack.c.bf16 %v1070_v52, %v1068_v57 }
 0x622   : > { %v1062_v41 = vpop.f32.mrf.mxu0 }
 0x623   : > { %v1063_v44 = vadd.f32 %v1062_v41, %v996_v35  ;;  %v1072_v53 = vmax.f32 %v1061_v43, 0.0 }
 0x624   : > { %v1064_v47 = vpop.f32.mrf.mxu0 }
 0x625   : > { %v1065_v49 = vadd.f32 %v1064_v47, %v996_v35  ;;  %v1073_v51 = vmax.f32 %v1063_v44, 0.0 }
 0x627   : > { %v1074_v54 = vmax.f32 %v1065_v49, 0.0  ;;  %v1077_v60 = vpack.c.bf16 %v1073_v51, %v1071_v56 }
 0x629   : > { %v1078_v58 = vpack.c.bf16 %v1074_v54, %v1072_v53 }
 0x62b   : > { %1137 = vmatprep.subr.bf16.mxu1 %v1078_v58 }
 0x62c   : > { %1138 = vmatpush1.bf16.msra.mxu1 %v1077_v60 }
 0x62d   : > { %1139 = vmatprep.subr.bf16.mxu1 %v1076_v61 }
 0x630   : > { %1140 = vmatpush1.bf16.msra.mxu1 %v1075_v63 }
 0x633   : > { %1482 = vmatmul.mubr.msk.bf16.vlgmr.msra.gmra.mxu1 %vm317_vm0, %v1568_v1 }
 0x634   : > { %1167 = vmatprep.mubr.bf16.mxu1 %v1660_v0  ;;  %v1092_v0 = vpop.permute.xlu0 %1091 }
 0x638   : > { %v1195_v35 = vpop.permute.xlu0 %1194 }
 0x63b   : > { %1483 = vmatmul.mubr.msk.bf16.gmra.mxu1 %vm317_vm0, %v1569_v2 }
 0x6f3   : > { %v1159_v3 = vpop.f32.mrf.mxu1 }
 0x6f4   : > { %v1160_v32 = vadd.f32 %v1159_v3, %v1092_v0 }
 0x6f5   : > { %v1161_v4 = vpop.f32.mrf.mxu1 }
 0x6f6   : > { %v1162_v22 = vadd.f32 %v1161_v4, %v1092_v0  ;;  %v1178_v30 = vmax.f32 %v1160_v32, 0.0 }
 0x6f7   : > { %v1163_v8 = vpop.f32.mrf.mxu1 }
 0x6f8   : > { %v1164_v24 = vadd.f32 %v1163_v8, %v1097_v15  ;;  %v1179_v10 = vmax.f32 %v1162_v22, 0.0 }
 0x6f9   : > { %v1165_v11 = vpop.f32.mrf.mxu1 }
 0x6fa   : > { %v1166_v17 = vadd.f32 %v1165_v11, %v1097_v15  ;;  %v1180_v28 = vmax.f32 %v1164_v24, 0.0  ;;  %v1279_v15 = vlaneseq }
 0x6fb   : > { %v1169_v13 = vpop.f32.mrf.mxu1 }
 0x6fc   : > { %v1170_v20 = vadd.f32 %v1169_v13, %v1102_v12  ;;  %v1181_v26 = vmax.f32 %v1166_v17, 0.0  ;;  %v1186_v33 = vpack.c.bf16 %v1180_v28, %v1178_v30 }
 0x6fd   : > { %v1171_v14 = vpop.f32.mrf.mxu1 }
 0x6fe   : > { %v1172_v18 = vadd.f32 %v1171_v14, %v1102_v12  ;;  %v1182_v34 = vmax.f32 %v1170_v20, 0.0  ;;  %v1187_v6 = vpack.c.bf16 %v1181_v26, %v1179_v10 }
 0x6ff   : > { %v1173_v16 = vpop.f32.mrf.mxu1 }
 0x700   : > { %v1174_v19 = vadd.f32 %v1173_v16, %v1107_v9  ;;  %v1183_v27 = vmax.f32 %v1172_v18, 0.0  ;;  %v1280_v16 = vshrl.u32 %v1279_v15, 7 }
 0x701   : > { %v1175_v21 = vpop.f32.mrf.mxu1 }
 0x702   : > { %v1176_v23 = vadd.f32 %v1175_v21, %v1107_v9  ;;  %v1184_v25 = vmax.f32 %v1174_v19, 0.0  ;;  %v1281_v17 = vsub.s32 3, %v1280_v16 }
 0x704   : > { %v1185_v31 = vmax.f32 %v1176_v23, 0.0  ;;  %v1188_v29 = vpack.c.bf16 %v1184_v25, %v1182_v34 }
 0x706   : > { %v1189_v36 = vpack.c.bf16 %v1185_v31, %v1183_v27 }
 0x708   : > { %1212 = vmatprep.subr.bf16.mxu0 %v1189_v36 }
 0x709   : > { %1213 = vmatpush1.bf16.msra.mxu0 %v1188_v29 }
 0x70a   : > { %1214 = vmatprep.subr.bf16.mxu0 %v1187_v6 }
 0x70d   : > { %1215 = vmatpush1.bf16.msra.mxu0 %v1186_v33 }
 0x710   : > { %1484 = vmatmul.mubr.msk.bf16.vlgmr.msra.gmra.mxu0 %vm317_vm0, %v1190_v5 }
 0x7d0   : > { %v1234_v37 = vpop.f32.mrf.mxu0 }
 0x7d1   : > { %v1235_v7 = vadd.f32 %v1234_v37, %v1195_v35 }
 0x7d2   : > { %v1236_v38 = vpop.f32.mrf.mxu0 }
 0x7d3   : > { %v1241_v39 = vmul.f32 0.92419624, %v1235_v7  ;;  %v1237_v40 = vadd.f32 %v1236_v38, %v1195_v35 }
 0x7d4   : > { %v1238_v41 = vpop.f32.mrf.mxu0 }
 0x7d5   : > { %v1245_v42 = vmin.f32 %v1241_v39, 20.0  ;;  %v1242_v43 = vmul.f32 0.92419624, %v1237_v40  ;;  %vm1243_vm3 = vcmp.gt.f32.partialorder %v1241_v39, 20.0 }
 0x7d6   : > { %v1239_v44 = vpop.f32.mrf.mxu0 }
 0x7d7   : > { %v1247_v45 = vmul.f32 1.442695, %v1245_v42  ;;  %v1246_v46 = vmin.f32 %v1242_v43, 20.0  ;;  %vm1244_vm4 = vcmp.gt.f32.partialorder %v1242_v43, 20.0 }
 0x7d9   : > { %1570 = vpow2.f32 %v1247_v45  ;;  %v1249_v47 = vmul.f32 1.442695, %v1246_v46 }
 0x7db   : > { %1572 = vpow2.f32 %v1249_v47 }
 0x7e6   : > { %v1571_v48 = vpop.eup %1570 }
 0x7e7   : > { %v1251_v49 = vadd.f32 1.0, %v1571_v48  ;;  %v1254_v52 = vmul.f32 -0.5, %v1571_v48  ;;  %v1257_v55 = vand.u32 2147483647, %v1571_v48 }
 0x7e8   : > { %v1573_v50 = vpop.eup %1572 }
 0x7e9   : > { %1574 = vlog2.f32 %v1251_v49  ;;  %v1260_v51 = vadd.f32 1.0, %v1573_v50  ;;  %v1263_v53 = vmul.f32 -0.5, %v1573_v50  ;;  %v1255_v54 = vadd.f32 1.0, %v1254_v52 }
 0x7ea   : > { %v1266_v58 = vand.u32 2147483647, %v1573_v50  ;;  %vm1258_vm1 = vcmp.lt.f32.partialorder %v1257_v55, 0.0004427343 }
 0x7eb   : > { %1576 = vlog2.f32 %v1260_v51  ;;  %v1264_v56 = vadd.f32 1.0, %v1263_v53  ;;  %v1256_v60 = vmul.f32 %v1571_v48, %v1255_v54 }
 0x7ec   : > { %vm1267_vm2 = vcmp.lt.f32.partialorder %v1266_v58, 0.0004427343 }
 0x7ed   : > { %v1265_v1 = vmul.f32 %v1573_v50, %v1264_v56 }
 0x7f6   : > { %v1575_v57 = vpop.eup %1574 }
 0x7f7   : > { %v1253_v59 = vmul.f32 0.6931472, %v1575_v57 }
 0x7f8   : > { %v1577_v61 = vpop.eup %1576 }
 0x7f9   : > { %v1259_v62 = vsel %vm1258_vm1, %v1256_v60, %v1253_v59  ;;  %v1262_v63 = vmul.f32 0.6931472, %v1577_v61 }
 0x7fa   : > { %v1269_v2 = vmul.f32 1.0820212, %v1259_v62 }
 0x7fb   : > { %v1268_v3 = vsel %vm1267_vm2, %v1265_v1, %v1262_v63 }
 0x7fc   : > { %v1271_v4 = vsel %vm1243_vm3, %v1235_v7, %v1269_v2  ;;  %v1270_v8 = vmul.f32 1.0820212, %v1268_v3 }
 0x7fd   : > { %v1273_v9 = vadd.f32 0.25, %v1271_v4 }
 0x7fe   : > { %v1272_v11 = vsel %vm1244_vm4, %v1237_v40, %v1270_v8 }
 0x7ff   : > { %v1275_v12 = vmin.f32 %v1273_v9, 100.0  ;;  %v1274_v13 = vadd.f32 0.25, %v1272_v11 }
 0x801   : > { %1578 = vrcp.f32 %v1275_v12  ;;  %v1276_v14 = vmin.f32 %v1274_v13, 100.0 }
 0x803   : > { %1580 = vrcp.f32 %v1276_v14 }
 0x80e   : > { %v1579_v18 = vpop.eup %1578 }
 0x80f   : > { %v1282_v19 = vrot.slane %v1579_v18, %v1281_v17 }
 0x810   : > { %v1581_v0 = vpop.eup %1580 }
 0x811   : > { %v1287_v20 = vmul.f32 %v1282_v19, %v1235_v7  ;;  %v1286_v21 = vrot.slane %v1581_v0, %v1281_v17 }
 0x813   : > { %v1288_v22 = vmul.f32 %v1286_v21, %v1237_v40  ;;  %1289 = vst [vmem:[%s242_s10] sm:$0xff] %v1287_v20 }
 0x815   : > { %1290 = vst [vmem:[%s242_s10 + $0x8] sm:$0xff] %v1288_v22 }
 0x816   : > { %1595 = shalt.err (!%p1592_p5)
}
 0x817   : > { %s1596_s25 = scalar_lea.hbm %s1306_s14, 256  ;;  %s1600_s7 = scalar_lea.hbm %s2038_s5, 512 }
 0x818   : > { %p1597_p6 = scmp.ne.s32.totalorder %s1306_s14, %s1596_s25  ;;  %p1601_p10 = scmp.lt.s32.totalorder %s1306_s14, %s2038_s5 }
 0x819   : > { %p1602_p11 = scmp.lt.s32.totalorder %s1600_s7, %s1596_s25 }
 0x81a   : > { %p1598_p7 = pnand %p1597_p6, %p1732_p4 }
 0x81b   : > { %p1603_p12 = por %p1602_p11, %p1601_p10 }
 0x81c   : > { %p1599_p9 = pneg %p1598_p7 }
 0x81e   : > { %p1604_p13 = pnand %p1603_p12, %p1599_p9 }
 0x820   : > { %1607 = shalt.err (!%p1604_p13)
}
 0x821   : > { %1492 = dma.vmem_to_hbm [thread:$0]  (%p1732_p4), %s1309_s11, 256, %s1306_s14, %s1292_s15  }
 0x822 PF: > { %p1498_p0 = scmp.ge.s32.totalorder %s1658_s23, 2  ;;  %s1320_s10 = sand.u32 1, %s1638_s18  }
 0x823   : > { %s1321_s12 = scalar_lea.sflag [#allocation3], %s1320_s10 }
 0x824   : > { %p1495_p1 = pnand %p1498_p0, %p1739_p8 }
 0x826   : > { %p1496_p2 = pneg %p1495_p1 }
 0x828   : > { %1633 = dma.done.wait (%p1496_p2), %s1321_s12, 256  }
 0x829   : > { %1635 = vsyncadd (%p1496_p2), %s1321_s12, 4294967040  ;;  %s18_s23 = sadd.s32 1, %s1658_s23   ;;  %s2041_s18 = smov %s1642_s19 }
 0x82a   : > { %p15_p3 = scmp.ge.s32.totalorder %s18_s23, 4   ;;  %s2042_s19 = smov %s1646_s20 }
 0x82b   : > { %s2043_s20 = smov %s1745_s6  ;;  %s2044_s21 = smov %s1654_s22 }
 0x82c   : > { %s2045_s22 = smov %s2047_s26  ;;  %17 = sbr.rel (!%p15_p3) target bundleno = 4 (0x4), region = 89 }
 0x831   :  { %1326 = vsyncpa [#allocation3], 1 }
 0x832   :  { %1328 = vsyncpa [#allocation3 + $0x1], 1 }

</bundles_post_ra>
